<compile_context>
chip_gen: v6e
topology: v6e:2x2x1
jax: 0.10.0
libtpu: 0.0.40
codegen_flags: <defaults>
</compile_context>

<pallas_src>
import functools

import jax
import jax.numpy as jnp
from jax.experimental import pallas as pl
from jax.experimental.pallas import tpu as pltpu


DEFAULT_BLOCK_ROWS = 512            # measured HBM-roofline sweet spot on v6e/v7x
_VMEM_LIMIT_BYTES = 32 * 1024 * 1024


def _round_up(x, m):
    return ((x + m - 1) // m) * m


# ---------------------------------------------------------------------------
# Fused encoder kernels
#   grid = (row_tiles, num_layers); layer axis innermost ("arbitrary").
#   h_scr (VMEM, bf16) carries the activation across the layer axis.
# ---------------------------------------------------------------------------
def _encoder_kernel_with_proj(h0_ref, mask_ref, w_ref, b_ref, fitw_ref,
                              fitb_ref, hid_ref, proj0_ref, proj_ref, h_scr):
    l = pl.program_id(1)
    fit_w = fitw_ref[...]                       # VMEM-resident across the grid
    fit_b = fitb_ref[...]

    @pl.when(l == 0)
    def _():
        h0 = h0_ref[...]                        # bf16 embedding tile
        h_scr[...] = h0
        # fit_dense projection of the embedding hidden state (layer 0).
        acc0 = jnp.dot(h0, fit_w, preferred_element_type=jnp.float32)
        proj0_ref[...] = (acc0 + fit_b).astype(proj0_ref.dtype)

    # layer l: h_{l+1} = tanh(h_l @ W_l + b_l) * mask   (f32 acc / epilogue)
    h_prev = h_scr[...]
    acc = jnp.dot(h_prev, w_ref[0], preferred_element_type=jnp.float32)
    h_new = jnp.tanh(acc + b_ref[0]) * mask_ref[...]
    h_new_bf = h_new.astype(jnp.bfloat16)
    h_scr[...] = h_new_bf
    hid_ref[0] = h_new_bf

    # fused fit_dense projection of this layer's hidden state.
    accp = jnp.dot(h_new_bf, fit_w, preferred_element_type=jnp.float32)
    proj_ref[0] = (accp + fit_b).astype(proj_ref.dtype)


def _encoder_kernel_no_proj(h0_ref, mask_ref, w_ref, b_ref, hid_ref, h_scr):
    l = pl.program_id(1)

    @pl.when(l == 0)
    def _():
        h_scr[...] = h0_ref[...]

    h_prev = h_scr[...]
    acc = jnp.dot(h_prev, w_ref[0], preferred_element_type=jnp.float32)
    h_new = jnp.tanh(acc + b_ref[0]) * mask_ref[...]
    h_new_bf = h_new.astype(jnp.bfloat16)
    h_scr[...] = h_new_bf
    hid_ref[0] = h_new_bf


def fused_encoder_layers(h0, mask, w_stack, b_stack, fit_w=None, fit_b=None,
                         *, block_rows=DEFAULT_BLOCK_ROWS):
    """Runs all encoder layers (and optionally fit_dense) in one pallas_call.

    h0:      (M, H)  bf16 embedding output (M = B*S rows of tokens)
    mask:    (M, 1)  f32 attention mask
    w_stack: (L, H, H) bf16, b_stack: (L, 1, H) f32
    fit_w:   (H, F) bf16, fit_b: (F,) f32  (student mode only)

    Returns hid (L, M, H) bf16, and if fit_w is given also
    proj0 (M, F) bf16 and proj (L, M, F) bf16.
    """
    M, H = h0.shape
    L = w_stack.shape[0]
    tm = min(block_rows, _round_up(M, 8))       # (8,128)-aligned row tile
    grid = (pl.cdiv(M, tm), L)                  # partial tail block is masked

    in_specs = [
        pl.BlockSpec((tm, H), lambda i, l: (i, 0)),      # h0 row tile (resident per i)
        pl.BlockSpec((tm, 1), lambda i, l: (i, 0)),      # mask row tile
        pl.BlockSpec((1, H, H), lambda i, l: (l, 0, 0)), # layer weight
        pl.BlockSpec((1, 1, H), lambda i, l: (l, 0, 0)), # layer bias
    ]
    args = [h0, mask, w_stack, b_stack]

    hid_shape = jax.ShapeDtypeStruct((L, M, H), jnp.bfloat16)
    hid_spec = pl.BlockSpec((1, tm, H), lambda i, l: (l, i, 0))
    scratch = [pltpu.VMEM((tm, H), jnp.bfloat16)]
    cparams = pltpu.CompilerParams(
        dimension_semantics=("parallel", "arbitrary"),
        vmem_limit_bytes=_VMEM_LIMIT_BYTES)

    if fit_w is None:
        return pl.pallas_call(
            _encoder_kernel_no_proj,
            out_shape=hid_shape,
            grid=grid,
            in_specs=in_specs,
            out_specs=hid_spec,
            scratch_shapes=scratch,
            compiler_params=cparams,
        )(*args)

    F = fit_w.shape[1]
    in_specs += [
        pl.BlockSpec((H, F), lambda i, l: (0, 0)),       # fit_dense W, VMEM-resident
        pl.BlockSpec((1, F), lambda i, l: (0, 0)),       # fit_dense b
    ]
    args += [fit_w, fit_b.reshape(1, F)]

    out_shape = (
        hid_shape,
        jax.ShapeDtypeStruct((M, F), jnp.bfloat16),      # proj of embedding layer
        jax.ShapeDtypeStruct((L, M, F), jnp.bfloat16),   # proj of each layer
    )
    out_specs = (
        hid_spec,
        pl.BlockSpec((tm, F), lambda i, l: (i, 0)),      # written at l==0, resident over l
        pl.BlockSpec((1, tm, F), lambda i, l: (l, i, 0)),
    )
    return pl.pallas_call(
        _encoder_kernel_with_proj,
        out_shape=out_shape,
        grid=grid,
        in_specs=in_specs,
        out_specs=out_specs,
        scratch_shapes=scratch,
        compiler_params=cparams,
    )(*args)


# ---------------------------------------------------------------------------
# Synthetic deterministic encoder (stand-in for the external `encoder` arg).
# ---------------------------------------------------------------------------
def init_encoder_params(key, vocab_size, hidden_size, num_layers, num_labels):
    k_emb, k_w, k_cls = jax.random.split(key, 3)
    embed = (0.02 * jax.random.normal(
        k_emb, (vocab_size, hidden_size), jnp.float32)).astype(jnp.bfloat16)
    w_stack = (0.02 * jax.random.normal(
        k_w, (num_layers, hidden_size, hidden_size),
        jnp.float32)).astype(jnp.bfloat16)
    b_stack = jnp.zeros((num_layers, 1, hidden_size), jnp.float32)
    cls_w = 0.02 * jax.random.normal(
        k_cls, (hidden_size, num_labels), jnp.float32)
    cls_b = jnp.zeros((num_labels,), jnp.float32)
    return {"embed": embed, "w_stack": w_stack, "b_stack": b_stack,
            "cls_w": cls_w, "cls_b": cls_b}


def encoder_forward(enc_params, input_ids, fit_w=None, fit_b=None):
    """Returns {'logits', 'hidden_states'[, 'proj_hidden_states']}."""
    # attention_mask = input_ids.ne(1), as in the PyTorch forward.
    attention_mask = (input_ids != 1).astype(jnp.float32)           # (B, S)
    h0 = jnp.take(enc_params["embed"], input_ids, axis=0)           # (B, S, H) bf16
    B, S, H = h0.shape
    M = B * S
    mask2d = attention_mask.reshape(M, 1)
    h0_2d = h0.reshape(M, H)

    # TODO(synk): the real encoder uses self-attention (and returns
    # output_attentions); this deterministic stand-in runs tanh(x@W+b)*mask
    # per layer, all layers fused into one Pallas kernel.
    if fit_w is None:
        hid = fused_encoder_layers(h0_2d, mask2d, enc_params["w_stack"],
                                   enc_params["b_stack"])
        proj0 = proj = None
    else:
        hid, proj0, proj = fused_encoder_layers(
            h0_2d, mask2d, enc_params["w_stack"], enc_params["b_stack"],
            fit_w, fit_b)

    L = enc_params["w_stack"].shape[0]

    # masked mean pooling -> classifier logits.  num_labels is tiny (2),
    # so keep this in plain XLA (fuses with the pooling) instead of Pallas.
    h_last = hid[L - 1].reshape(B, S, H).astype(jnp.float32)
    denom = jnp.maximum(attention_mask.sum(axis=1, keepdims=True), 1.0)
    pooled = h_last.sum(axis=1) / denom                              # (B, H)
    logits = pooled @ enc_params["cls_w"] + enc_params["cls_b"]

    hidden_states = (h0,) + tuple(hid[l].reshape(B, S, H) for l in range(L))
    out = {"logits": logits, "hidden_states": hidden_states}
    if proj is not None:
        F = proj.shape[-1]
        out["proj_hidden_states"] = (proj0.reshape(B, S, F),) + tuple(
            proj[l].reshape(B, S, F) for l in range(L))
    return out


# ---------------------------------------------------------------------------
# Model: encoder + fit_dense applied to every hidden-state layer (fused).
# ---------------------------------------------------------------------------
def init_model_params(key, vocab_size, hidden_size, num_layers, num_labels,
                      fit_size):
    k_enc, k_fw = jax.random.split(key, 2)
    enc = init_encoder_params(k_enc, vocab_size, hidden_size, num_layers,
                              num_labels)
    bound = 1.0 / float(hidden_size) ** 0.5
    fit_w = jax.random.uniform(k_fw, (hidden_size, fit_size), jnp.float32,
                               -bound, bound).astype(jnp.bfloat16)
    fit_b = jnp.zeros((fit_size,), jnp.float32)
    return {"encoder": enc, "fit_w": fit_w, "fit_b": fit_b}


def model_forward(params, input_ids, mod="train", is_student=False):
    if is_student:
        # fit_dense is fused into the encoder-layer kernel's epilogue so the
        # hidden states never make an extra HBM round trip before projection.
        outputs = encoder_forward(params["encoder"], input_ids,
                                  fit_w=params["fit_w"],
                                  fit_b=params["fit_b"])
        outputs["hidden_states"] = outputs.pop("proj_hidden_states")
    else:
        outputs = encoder_forward(params["encoder"], input_ids)
    if mod == "train":
        return outputs
    return outputs["logits"]


# ---------------------------------------------------------------------------
if __name__ == "__main__":
    # Small shapes consistent with the module's forward; feature dims stay
    # lane-dense (multiples of 128).
    B, S = 2, 8                # batch, sequence length
    VOCAB = 50
    HIDDEN = 128               # encoder.config.hidden_size
    NUM_LAYERS = 2
    NUM_LABELS = 2
    FIT_SIZE = 128             # fit_size (default 768 in PyTorch; small here)

    key = jax.random.PRNGKey(0)
    k_params, k_ids = jax.random.split(key)
    params = init_model_params(k_params, VOCAB, HIDDEN, NUM_LAYERS,
                               NUM_LABELS, FIT_SIZE)
    input_ids = jax.random.randint(k_ids, (B, S), 0, VOCAB, dtype=jnp.int32)
    # make sure a couple of tokens hit the pad id (1) so the mask matters
    input_ids = input_ids.at[:, -1].set(1)

    fwd = jax.jit(functools.partial(model_forward, mod="train",
                                    is_student=True))
    out = fwd(params, input_ids)
    jax.block_until_ready(out)

    assert out["logits"].shape == (B, NUM_LABELS)
    assert len(out["hidden_states"]) == NUM_LAYERS + 1
    for h in out["hidden_states"]:
        assert h.shape == (B, S, FIT_SIZE)

    # eval path returns logits only
    logits_only = jax.jit(functools.partial(model_forward, mod="eval",
                                            is_student=False))(params,
                                                               input_ids)
    jax.block_until_ready(logits_only)
    assert logits_only.shape == (B, NUM_LABELS)

    print("KERNEL_OK")
</pallas_src>

<mosaic_0001>
module attributes {stable_mosaic.version = 11 : i64} {
  func.func @_encoder_kernel_with_proj(%arg0: i32, %arg1: i32, %arg2: memref<16x128xbf16, #tpu.memory_space<vmem>>, %arg3: memref<16x1xf32, #tpu.memory_space<vmem>>, %arg4: memref<1x128x128xbf16, #tpu.memory_space<vmem>>, %arg5: memref<1x1x128xf32, #tpu.memory_space<vmem>>, %arg6: memref<128x128xbf16, #tpu.memory_space<vmem>>, %arg7: memref<1x128xf32, #tpu.memory_space<vmem>>, %arg8: memref<1x16x128xbf16, #tpu.memory_space<vmem>>, %arg9: memref<16x128xbf16, #tpu.memory_space<vmem>>, %arg10: memref<1x16x128xbf16, #tpu.memory_space<vmem>>, %arg11: memref<16x128xbf16, #tpu.memory_space<vmem>>) attributes {dimension_semantics = [#tpu.dimension_semantics<parallel>, #tpu.dimension_semantics<arbitrary>], iteration_bounds = array<i64: 1, 2>, scalar_prefetch = 0 : i64, scratch_operands = 1 : i64, tpu.core_type = #tpu.core_type<tc>, window_params = [{transform_indices = @transform_0, window_bounds = array<i64: 16, 128>}, {transform_indices = @transform_1, window_bounds = array<i64: 16, 1>}, {transform_indices = @transform_2, window_bounds = array<i64: 1, 128, 128>}, {transform_indices = @transform_3, window_bounds = array<i64: 1, 1, 128>}, {pipeline_mode = #tpu.pipeline_mode<synchronous>, transform_indices = @transform_4, window_bounds = array<i64: 128, 128>}, {pipeline_mode = #tpu.pipeline_mode<synchronous>, transform_indices = @transform_5, window_bounds = array<i64: 1, 128>}, {transform_indices = @transform_6, window_bounds = array<i64: 1, 16, 128>}, {transform_indices = @transform_7, window_bounds = array<i64: 16, 128>}, {transform_indices = @transform_8, window_bounds = array<i64: 1, 16, 128>}]} {
    %c0 = arith.constant 0 : index
    %c0_0 = arith.constant 0 : index
    %0 = vector.load %arg6[%c0, %c0_0] : memref<128x128xbf16, #tpu.memory_space<vmem>>, vector<128x128xbf16>
    %c0_1 = arith.constant 0 : index
    %c0_2 = arith.constant 0 : index
    %1 = vector.load %arg7[%c0_1, %c0_2] : memref<1x128xf32, #tpu.memory_space<vmem>>, vector<1x128xf32>
    %c0_i32 = arith.constant 0 : i32
    %2 = arith.cmpi eq, %arg1, %c0_i32 : i32
    %3 = arith.extui %2 : i1 to i32
    %c0_i32_3 = arith.constant 0 : i32
    %4 = arith.cmpi ne, %3, %c0_i32_3 : i32
    scf.if %4 {
      %c0_23 = arith.constant 0 : index
      %c0_24 = arith.constant 0 : index
      %29 = vector.load %arg2[%c0_23, %c0_24] : memref<16x128xbf16, #tpu.memory_space<vmem>>, vector<16x128xbf16>
      %c0_25 = arith.constant 0 : index
      %c0_26 = arith.constant 0 : index
      %30 = vector.load %arg11[%c0_25, %c0_26] : memref<16x128xbf16, #tpu.memory_space<vmem>>, vector<16x128xbf16>
      tpu.vector_store %arg11[%c0_25, %c0_26], %29 {strides = array<i32>} : memref<16x128xbf16, #tpu.memory_space<vmem>>, vector<16x128xbf16>,
      %cst_27 = arith.constant dense<0.000000e+00> : vector<16x128xf32>
      %31 = tpu.matmul %29, %0, %cst_27 {dimension_numbers = #tpu.dot_dimension_numbers<[1], [0], [0], [1], [0, 0, 1, 1], [], []>} : vector<16x128xbf16>, vector<128x128xbf16>, vector<16x128xf32> -> vector<16x128xf32>
      %32 = vector.broadcast %1 : vector<1x128xf32> to vector<16x128xf32>
      %33 = arith.addf %31, %32 : vector<16x128xf32>
      %34 = arith.truncf %33 : vector<16x128xf32> to vector<16x128xbf16>
      %c0_28 = arith.constant 0 : index
      %c0_29 = arith.constant 0 : index
      %35 = vector.load %arg9[%c0_28, %c0_29] : memref<16x128xbf16, #tpu.memory_space<vmem>>, vector<16x128xbf16>
      tpu.vector_store %arg9[%c0_28, %c0_29], %34 {strides = array<i32>} : memref<16x128xbf16, #tpu.memory_space<vmem>>, vector<16x128xbf16>,
    } else {
    }
    %c0_4 = arith.constant 0 : index
    %c0_5 = arith.constant 0 : index
    %5 = vector.load %arg11[%c0_4, %c0_5] : memref<16x128xbf16, #tpu.memory_space<vmem>>, vector<16x128xbf16>
    %c0_6 = arith.constant 0 : index
    %c0_7 = arith.constant 0 : index
    %c0_8 = arith.constant 0 : index
    %6 = vector.load %arg4[%c0_6, %c0_7, %c0_8] : memref<1x128x128xbf16, #tpu.memory_space<vmem>>, vector<1x128x128xbf16>
    %7 = vector.shape_cast %6 : vector<1x128x128xbf16> to vector<128x128xbf16>
    %cst = arith.constant dense<0.000000e+00> : vector<16x128xf32>
    %8 = tpu.matmul %5, %7, %cst {dimension_numbers = #tpu.dot_dimension_numbers<[1], [0], [0], [1], [0, 0, 1, 1], [], []>} : vector<16x128xbf16>, vector<128x128xbf16>, vector<16x128xf32> -> vector<16x128xf32>
    %c0_9 = arith.constant 0 : index
    %c0_10 = arith.constant 0 : index
    %c0_11 = arith.constant 0 : index
    %9 = vector.load %arg5[%c0_9, %c0_10, %c0_11] : memref<1x1x128xf32, #tpu.memory_space<vmem>>, vector<1x1x128xf32>
    %10 = vector.shape_cast %9 : vector<1x1x128xf32> to vector<1x128xf32>
    %11 = vector.broadcast %10 : vector<1x128xf32> to vector<16x128xf32>
    %12 = arith.addf %8, %11 : vector<16x128xf32>
    %13 = math.tanh %12 : vector<16x128xf32>
    %c0_12 = arith.constant 0 : index
    %c0_13 = arith.constant 0 : index
    %14 = vector.load %arg3[%c0_12, %c0_13] : memref<16x1xf32, #tpu.memory_space<vmem>>, vector<16x1xf32>
    %15 = vector.broadcast %14 : vector<16x1xf32> to vector<16x128xf32>
    %16 = arith.mulf %13, %15 : vector<16x128xf32>
    %17 = arith.truncf %16 : vector<16x128xf32> to vector<16x128xbf16>
    %c0_14 = arith.constant 0 : index
    %c0_15 = arith.constant 0 : index
    %18 = vector.load %arg11[%c0_14, %c0_15] : memref<16x128xbf16, #tpu.memory_space<vmem>>, vector<16x128xbf16>
    tpu.vector_store %arg11[%c0_14, %c0_15], %17 {strides = array<i32>} : memref<16x128xbf16, #tpu.memory_space<vmem>>, vector<16x128xbf16>,
    %c0_16 = arith.constant 0 : index
    %c0_17 = arith.constant 0 : index
    %c0_18 = arith.constant 0 : index
    %19 = vector.load %arg8[%c0_16, %c0_17, %c0_18] : memref<1x16x128xbf16, #tpu.memory_space<vmem>>, vector<1x16x128xbf16>
    %20 = vector.shape_cast %19 : vector<1x16x128xbf16> to vector<16x128xbf16>
    %21 = vector.shape_cast %17 : vector<16x128xbf16> to vector<1x16x128xbf16>
    tpu.vector_store %arg8[%c0_16, %c0_17, %c0_18], %21 {strides = array<i32>} : memref<1x16x128xbf16, #tpu.memory_space<vmem>>, vector<1x16x128xbf16>,
    %cst_19 = arith.constant dense<0.000000e+00> : vector<16x128xf32>
    %22 = tpu.matmul %17, %0, %cst_19 {dimension_numbers = #tpu.dot_dimension_numbers<[1], [0], [0], [1], [0, 0, 1, 1], [], []>} : vector<16x128xbf16>, vector<128x128xbf16>, vector<16x128xf32> -> vector<16x128xf32>
    %23 = vector.broadcast %1 : vector<1x128xf32> to vector<16x128xf32>
    %24 = arith.addf %22, %23 : vector<16x128xf32>
    %25 = arith.truncf %24 : vector<16x128xf32> to vector<16x128xbf16>
    %c0_20 = arith.constant 0 : index
    %c0_21 = arith.constant 0 : index
    %c0_22 = arith.constant 0 : index
    %26 = vector.load %arg10[%c0_20, %c0_21, %c0_22] : memref<1x16x128xbf16, #tpu.memory_space<vmem>>, vector<1x16x128xbf16>
    %27 = vector.shape_cast %26 : vector<1x16x128xbf16> to vector<16x128xbf16>
    %28 = vector.shape_cast %25 : vector<16x128xbf16> to vector<1x16x128xbf16>
    tpu.vector_store %arg10[%c0_20, %c0_21, %c0_22], %28 {strides = array<i32>} : memref<1x16x128xbf16, #tpu.memory_space<vmem>>, vector<1x16x128xbf16>,
    return
  }
  func.func @transform_0(%arg0: i32, %arg1: i32) -> (i32, i32) {
    %c0_i32 = arith.constant 0 : i32
    %c0_i32_0 = arith.constant 0 : i32
    return %arg0, %c0_i32 : i32, i32
  }
  func.func @transform_1(%arg0: i32, %arg1: i32) -> (i32, i32) {
    %c0_i32 = arith.constant 0 : i32
    %c0_i32_0 = arith.constant 0 : i32
    return %arg0, %c0_i32 : i32, i32
  }
  func.func @transform_2(%arg0: i32, %arg1: i32) -> (i32, i32, i32) {
    %c0_i32 = arith.constant 0 : i32
    %c0_i32_0 = arith.constant 0 : i32
    %c0_i32_1 = arith.constant 0 : i32
    return %arg1, %c0_i32, %c0_i32_0 : i32, i32, i32
  }
  func.func @transform_3(%arg0: i32, %arg1: i32) -> (i32, i32, i32) {
    %c0_i32 = arith.constant 0 : i32
    %c0_i32_0 = arith.constant 0 : i32
    %c0_i32_1 = arith.constant 0 : i32
    return %arg1, %c0_i32, %c0_i32_0 : i32, i32, i32
  }
  func.func @transform_4(%arg0: i32, %arg1: i32) -> (i32, i32) {
    %c0_i32 = arith.constant 0 : i32
    %c0_i32_0 = arith.constant 0 : i32
    %c0_i32_1 = arith.constant 0 : i32
    return %c0_i32, %c0_i32_0 : i32, i32
  }
  func.func @transform_5(%arg0: i32, %arg1: i32) -> (i32, i32) {
    %c0_i32 = arith.constant 0 : i32
    %c0_i32_0 = arith.constant 0 : i32
    %c0_i32_1 = arith.constant 0 : i32
    return %c0_i32, %c0_i32_0 : i32, i32
  }
  func.func @transform_6(%arg0: i32, %arg1: i32) -> (i32, i32, i32) {
    %c0_i32 = arith.constant 0 : i32
    %c0_i32_0 = arith.constant 0 : i32
    return %arg1, %arg0, %c0_i32 : i32, i32, i32
  }
  func.func @transform_7(%arg0: i32, %arg1: i32) -> (i32, i32) {
    %c0_i32 = arith.constant 0 : i32
    %c0_i32_0 = arith.constant 0 : i32
    return %arg0, %c0_i32 : i32, i32
  }
  func.func @transform_8(%arg0: i32, %arg1: i32) -> (i32, i32, i32) {
    %c0_i32 = arith.constant 0 : i32
    %c0_i32_0 = arith.constant 0 : i32
    return %arg1, %arg0, %c0_i32 : i32, i32, i32
  }
}

</mosaic_0001>

<bundles_post_ra>
// kernel: model_forward.1
= control target key start
LH: loop header
LB: loop body
LE: loop exit
PB: predicated region body
PF: predicated region fallthrough
CT: control target
= control target key end

     0   :  { %14 = vsyncpa [#allocation4], 0  ;;  %s1596_s0 = inlined_call_operand.vmem [shape: bf16[16,128], index: 0, kind: input, shape index: {}]   ;;  %s1597_s1 = inlined_call_operand.vmem [shape: f32[16,1], index: 1, kind: input, shape index: {}]   ;;  %s1598_s2 = inlined_call_operand.vmem [shape: bf16[2,128,128], index: 2, kind: input, shape index: {}]   ;;  %s1599_s3 = inlined_call_operand.vmem [shape: f32[2,1,128], index: 3, kind: input, shape index: {}]   ;;  %s1600_s4 = inlined_call_operand.hbm [shape: bf16[128,128], index: 4, kind: input, shape index: {}]   ;;  %s1601_s5 = inlined_call_operand.vmem [shape: f32[1,128], index: 5, kind: input, shape index: {}]   ;;  %s1602_s6 = inlined_call_operand.vmem [shape: bf16[2,16,128], index: 6, kind: output, shape index: {0}]   ;;  %s1603_s7 = inlined_call_operand.hbm [shape: bf16[16,128], index: 7, kind: output, shape index: {1}]   ;;  %s1604_s8 = inlined_call_operand.vmem [shape: bf16[2,16,128], index: 8, kind: output, shape index: {2}]  }
   0x1   :  { %15 = vsyncpa [#allocation5], 0  ;;  %s1406_s27 = smov 0   ;;  %s1408_s28 = smov 0  }
   0x2   :  { %s1410_s29 = smov 0  }
   0x3 LB: > { %s1033_s30 = sadd.s32 4294967295, %s1348_s29   ;;  %s30_s9 = sadd.s32 1, %s1344_s28  ;;  %s1348_s29 = sphi %s1410_s29, %s21_s29   ;;  %s1344_s28 = sphi %s1408_s28, %s1609_s28   ;;  %s1340_s27 = sphi %s1406_s27, %s1608_s27  }
   0x4   : > { %p31_p0 = scmp.ge.s32.totalorder %s30_s9, 2  ;;  %p1035_p1 = scmp.ge.s32.totalorder %s1348_s29, 1 }
   0x5   : > { %p266_p2 = scmp.lt.s32.totalorder %s1348_s29, 3  ;;  %p1433_p4 = scmp.eq.s32.totalorder %s1033_s30, 0 }
   0x6   : > { %s1611_s9 = smov (%p31_p0, %s30_s9), 0  ;;  %s1350_s12 = smov [#allocation3]  }
   0x7   : > { %p1427_p3 = pnand %p1035_p1, %p266_p2  ;;  %s296_s13 = sshll.u32 %s1350_s12, 4  ;;  %s297_s13 = int_to_ptr.vmem [resolvable:$true] %s296_s13 }
   0x8   : > { %s1279_s14 = scalar_lea.vmem %s297_s13, 1024  ;;  %p1287_p11 = scmp.lt.s32.totalorder %s297_s13, %s297_s13 }
   0x9   : > { %p1210_p5 = pneg %p1427_p3  ;;  %p1280_p8 = scmp.ne.s32.totalorder %s297_s13, %s1279_s14 }
   0xa   : > { %p1288_p12 = scmp.lt.s32.totalorder %s1279_s14, %s1279_s14 }
   0xb   : > { %p1211_p6 = pnand %p1433_p4, %p1210_p5 }
   0xc   : > { %p1289_p13 = por %p1288_p12, %p1287_p11 }
   0xd   : > { %p1270_p7 = pneg %p1211_p6 }
   0xf   : > { %p1282_p9 = pnand %p1280_p8, %p1270_p7 }
  0x11   : > { %p1283_p10 = pneg %p1282_p9 }
  0x13   : > { %p1290_p0 = pnand %p1289_p13, %p1283_p10 }
  0x15   : > { %1293 = shalt.err (!%p1290_p0)
}
  0x16   : > { %s1351_s15 = smov 64   ;;  %s1352_s16 = smov 4  }
  0x17   : > { %1213 = dma.hbm_to_vmem [thread:$0]  (!%p1211_p6), %s1600_s4, 1024, %s297_s13, [#allocation4], %s1351_s15, %s1351_s15, %s1352_s16  }
  0x18   : > { %329 = sbr.rel (%p1427_p3) target bundleno = 731 (0x2db), region = 44 }
  0x1d   : > { %1331 = dma.done.wait (%p1433_p4), [#allocation4], 1024  }
  0x1e   : > { %1333 = vsyncadd (%p1433_p4), [#allocation4], 4294966272  ;;  %p401_p1 = scmp.lt.s32.totalorder %s1340_s27, 1  ;;  %v1475_v0 = vld [vmem:[#allocation3] sm:$0xf]  ;;  %p1048_p2 = scmp.ne.s32.totalorder %s1340_s27, 0 }
  0x1f   : > { %v1477_v1 = vld [vmem:[#allocation3 + $0x4] sm:$0xf]  ;;  %v1479_v2 = vld [vmem:[#allocation3 + $0x8] sm:$0xf]  ;;  %v1481_v3 = vld [vmem:[#allocation3 + $0xc] sm:$0xf] }
  0x20   : > { %s1452_s19 = scalar_select %p401_p1, %s1340_s27, 1  ;;  %v1483_v4 = vld [vmem:[#allocation3 + $0x10] sm:$0xf]  ;;  %v1485_v5 = vld [vmem:[#allocation3 + $0x14] sm:$0xf] }
  0x21   : > { %v1487_v6 = vld [vmem:[#allocation3 + $0x18] sm:$0xf]  ;;  %v1489_v7 = vld [vmem:[#allocation3 + $0x1c] sm:$0xf]  ;;  %v1491_v8 = vld [vmem:[#allocation3 + $0x20] sm:$0xf] }
  0x22   : > { %s1086_s20 = sshll.u32 %s1452_s19, 6  ;;  %s408_s23 = scalar_lea.vmem %s1599_s3, %s1452_s19  ;;  %v1493_v9 = vld [vmem:[#allocation3 + $0x24] sm:$0xf]  ;;  %v1495_v10 = vld [vmem:[#allocation3 + $0x28] sm:$0xf] }
  0x23   : > { %s1462_s26 = scalar_lea.vmem %s1598_s2, %s1086_s20  ;;  %s1087_s10 = sshll.u32 %s1452_s19, 3  ;;  %v1497_v11 = vld [vmem:[#allocation3 + $0x2c] sm:$0xf]  ;;  %v1499_v12 = vld [vmem:[#allocation3 + $0x30] sm:$0xf] }
  0x24   : > { %s1468_s13 = scalar_lea.vmem %s1602_s6, %s1087_s10  ;;  %s1473_s16 = scalar_lea.vmem %s1604_s8, %s1087_s10  ;;  %v1501_v13 = vld [vmem:[#allocation3 + $0x34] sm:$0xf]  ;;  %v1503_v14 = vld [vmem:[#allocation3 + $0x38] sm:$0xf]  ;;  %v446_v15 = vld [vmem:[#allocation3 + $0x3c] sm:$0xf] }
  0x25   : > { %v1508_v16 = vld [vmem:[%s1601_s5] sm:$0x1]  ;;  %451 = sbr.rel (%p1048_p2) target bundleno = 277 (0x115), region = 52 }
  0x2a   : > { %v1057_v17 = vcombine.low %v1503_v14, %v446_v15  ;;  %v452_v18 = vld [vmem:[%s1596_s0] sm:$0xf]  ;;  %v453_v19 = vld [vmem:[%s1596_s0 + $0x4] sm:$0xf]  ;;  %v1353_v20 = vmov 0.0   ;;  %v1056_v21 = vcombine.low %v1499_v12, %v1501_v13  ;;  %vm1354_vm0 = vmmov 0  }
  0x2b   : > { %1142 = vmatprep.subr.bf16.mxu0 %v1353_v20  ;;  %454 = vst [vmem:[#allocation2] sm:$0xf] %v452_v18  ;;  %455 = vst [vmem:[#allocation2 + $0x4] sm:$0xf] %v453_v19  ;;  %1158 = vmatprep.mubr.msk.bf16.mxu0 %vm1354_vm0, %v1353_v20  ;;  %v1055_v22 = vcombine.low %v1495_v10, %v1497_v11  ;;  %v1054_v23 = vcombine.low %v1491_v8, %v1493_v9  ;;  %v457_v29 = vlaneseq }
  0x2c   : > { %1143 = vmatpush3.bf16.msra.mxu0 %v1057_v17  ;;  %v1053_v24 = vcombine.low %v1487_v6, %v1489_v7  ;;  %v1052_v25 = vcombine.low %v1483_v4, %v1485_v5  ;;  %v1051_v26 = vcombine.low %v1479_v2, %v1481_v3  ;;  %v1050_v27 = vcombine.low %v1475_v0, %v1477_v1 }
  0x2d   : > { %1144 = vmatprep.subr.bf16.mxu0 %v1353_v20  ;;  %v1049_v28 = vcombine.low %v452_v18, %v453_v19  ;;  %v458_v30 = vshrl.u32 %v457_v29, 7 }
  0x2f   : > { %v459_v31 = vsub.s32 0, %v458_v30 }
  0x30   : > { %1145 = vmatpush3.bf16.msra.mxu0 %v1056_v21 }
  0x31   : > { %1146 = vmatprep.subr.bf16.mxu0 %v1353_v20  ;;  %v460_v33 = vrot.slane %v1508_v16, %v459_v31 }
  0x34   : > { %1147 = vmatpush3.bf16.msra.mxu0 %v1055_v22 }
  0x35   : > { %1148 = vmatprep.subr.bf16.mxu0 %v1353_v20 }
  0x38   : > { %1149 = vmatpush3.bf16.msra.mxu0 %v1054_v23 }
  0x39   : > { %1150 = vmatprep.subr.bf16.mxu0 %v1353_v20 }
  0x3c   : > { %1151 = vmatpush3.bf16.msra.mxu0 %v1053_v24 }
  0x3d   : > { %1152 = vmatprep.subr.bf16.mxu0 %v1353_v20 }
  0x40   : > { %1153 = vmatpush3.bf16.msra.mxu0 %v1052_v25 }
  0x41   : > { %1154 = vmatprep.subr.bf16.mxu0 %v1353_v20 }
  0x44   : > { %1155 = vmatpush3.bf16.msra.mxu0 %v1051_v26 }
  0x45   : > { %1156 = vmatprep.subr.bf16.mxu0 %v1353_v20 }
  0x48   : > { %1157 = vmatpush3.bf16.msra.mxu0 %v1050_v27 }
  0x4b   : > { %1159 = vmatmul.mubr.bf16.vlgmr.msra.gmra.mxu0 %v1049_v28 }
 0x10b   : > { %v550_v32 = vpop.f32.mrf.mxu0 }
 0x10c   : > { %v551_v36 = vadd.f32 %v550_v32, %v460_v33 }
 0x10d   : > { %v1160_v34 = vpop.f32.mrf.mxu0 }
 0x10f   : > { %v553_v35 = vpop.f32.mrf.mxu0 }
 0x110   : > { %v554_v37 = vadd.f32 %v553_v35, %v460_v33 }
 0x111   : > { %v1161_v38 = vpop.f32.mrf.mxu0 }
 0x112   : > { %v1098_v39 = vpack.c.bf16 %v554_v37, %v551_v36 }
 0x114   : > { %1099 = vst [vmem:[#allocation6] sm:$0xff] %v1098_v39  }
 0x115 PF: > { %v1255_v40 = vld [vmem:[%s1462_s26 + $0x38] sm:$0xff]   ;;  %v1079_v41 = vcombine.low %v1503_v14, %v446_v15  ;;  %v1355_v42 = vmov 0.0   ;;  %v1256_v43 = vld [vmem:[%s1462_s26 + $0x30] sm:$0xff]   ;;  %vm1356_vm1 = vmmov 0   ;;  %v1357_v44 = vmov 0   ;;  %v1257_v46 = vld [vmem:[%s1462_s26 + $0x28] sm:$0xff]  }
 0x116   : > { %1162 = vmatprep.subr.bf16.mxu0 %v1355_v42  ;;  %1182 = vmatprep.subr.bf16.mxu1 %v1355_v42  ;;  %v1078_v45 = vcombine.low %v1499_v12, %v1501_v13  ;;  %v689_v47 = vld [vmem:[%s1597_s1] sm:$0xff]  ;;  %v690_v49 = vld [vmem:[%s1597_s1 + $0x8] sm:$0xff]  ;;  %v1259_v50 = vld [vmem:[%s1462_s26 + $0x18] sm:$0xff]   ;;  %v1077_v55 = vcombine.low %v1495_v10, %v1497_v11  ;;  %v1076_v56 = vcombine.low %v1491_v8, %v1493_v9  ;;  %p1570_p3 = scmp.eq.s32.totalorder %s1033_s30, 1 }
 0x117   : > { %1163 = vmatpush3.bf16.msra.mxu0 %v1255_v40  ;;  %1178 = vmatprep.mubr.msk.bf16.mxu0 %vm1356_vm1, %v1355_v42  ;;  %v1258_v48 = vld [vmem:[%s1462_s26 + $0x20] sm:$0xff]   ;;  %v1260_v51 = vld [vmem:[%s1462_s26 + $0x10] sm:$0xff]   ;;  %v1261_v52 = vld [vmem:[%s1462_s26 + $0x8] sm:$0xff]   ;;  %v1075_v57 = vcombine.low %v1487_v6, %v1489_v7  ;;  %v1074_v58 = vcombine.low %v1483_v4, %v1485_v5  ;;  %v1073_v59 = vcombine.low %v1479_v2, %v1481_v3 }
 0x118   : > { %1164 = vmatprep.subr.bf16.mxu0 %v1355_v42  ;;  %1254 = vset.pattern.permute.xlu0 %v1357_v44  ;;  %v1262_v53 = vld [vmem:[%s1462_s26] sm:$0xff]   ;;  %v1072_v60 = vcombine.low %v1475_v0, %v1477_v1 }
 0x119   : > { %1183 = vmatpush3.bf16.msra.mxu1 %v1079_v41  ;;  %1198 = vmatprep.mubr.msk.bf16.mxu1 %vm1356_vm1, %v1355_v42  ;;  %v1263_v54 = vld [vmem:[#allocation2] sm:$0xff]  }
 0x11a   : > { %1184 = vmatprep.subr.bf16.mxu1 %v1355_v42  ;;  %693 = vperm.xlu0 %1254, %v689_v47   ;;  %v1060_v61 = vld [vmem:[%s408_s23] ss:$0 sm:$0xff]  ;;  %s1358_s23 = smov [#allocation6]  }
 0x11b   : > { %1165 = vmatpush3.bf16.msra.mxu0 %v1256_v43  ;;  %s851_s14 = sshll.u32 %s1358_s23, 4  ;;  %s852_s14 = int_to_ptr.vmem [resolvable:$true] %s851_s14 }
 0x11c   : > { %1166 = vmatprep.subr.bf16.mxu0 %v1355_v42  ;;  %s1294_s15 = scalar_lea.vmem %s852_s14, 128  ;;  %p1301_p7 = scmp.lt.s32.totalorder %s852_s14, %s852_s14 }
 0x11d   : > { %1185 = vmatpush3.bf16.msra.mxu1 %v1078_v45  ;;  %p1295_p4 = scmp.ne.s32.totalorder %s852_s14, %s1294_s15  ;;  %p1302_p8 = scmp.lt.s32.totalorder %s1294_s15, %s1294_s15 }
 0x11e   : > { %1186 = vmatprep.subr.bf16.mxu1 %v1355_v42  ;;  %698 = vperm.xlu0 %1254, %v690_v49  }
 0x11f   : > { %1167 = vmatpush3.bf16.msra.mxu0 %v1257_v46  ;;  %p1296_p5 = pnand %p1295_p4, %p1570_p3  ;;  %p1303_p9 = por %p1302_p8, %p1301_p7 }
 0x120   : > { %1168 = vmatprep.subr.bf16.mxu0 %v1355_v42 }
 0x121   : > { %1187 = vmatpush3.bf16.msra.mxu1 %v1077_v55  ;;  %p1297_p6 = pneg %p1296_p5 }
 0x122   : > { %1188 = vmatprep.subr.bf16.mxu1 %v1355_v42 }
 0x123   : > { %1169 = vmatpush3.bf16.msra.mxu0 %v1258_v48  ;;  %p1304_p10 = pnand %p1303_p9, %p1297_p6 }
 0x124   : > { %1170 = vmatprep.subr.bf16.mxu0 %v1355_v42 }
 0x125   : > { %1189 = vmatpush3.bf16.msra.mxu1 %v1076_v56 }
 0x126   : > { %1190 = vmatprep.subr.bf16.mxu1 %v1355_v42 }
 0x127   : > { %1171 = vmatpush3.bf16.msra.mxu0 %v1259_v50 }
 0x128   : > { %1172 = vmatprep.subr.bf16.mxu0 %v1355_v42 }
 0x129   : > { %1191 = vmatpush3.bf16.msra.mxu1 %v1075_v57 }
 0x12a   : > { %1192 = vmatprep.subr.bf16.mxu1 %v1355_v42 }
 0x12b   : > { %1173 = vmatpush3.bf16.msra.mxu0 %v1260_v51 }
 0x12c   : > { %1174 = vmatprep.subr.bf16.mxu0 %v1355_v42 }
 0x12d   : > { %1193 = vmatpush3.bf16.msra.mxu1 %v1074_v58 }
 0x12e   : > { %1194 = vmatprep.subr.bf16.mxu1 %v1355_v42 }
 0x12f   : > { %1175 = vmatpush3.bf16.msra.mxu0 %v1261_v52 }
 0x130   : > { %1176 = vmatprep.subr.bf16.mxu0 %v1355_v42 }
 0x131   : > { %1195 = vmatpush3.bf16.msra.mxu1 %v1073_v59 }
 0x132   : > { %1196 = vmatprep.subr.bf16.mxu1 %v1355_v42 }
 0x133   : > { %1177 = vmatpush3.bf16.msra.mxu0 %v1262_v53 }
 0x135   : > { %1197 = vmatpush3.bf16.msra.mxu1 %v1072_v60 }
 0x136   : > { %1179 = vmatmul.mubr.bf16.vlgmr.msra.gmra.mxu0 %v1263_v54 }
 0x195   : > { %v694_v3 = vpop.permute.xlu0 %693 }
 0x199   : > { %v699_v0 = vpop.permute.xlu0 %698 }
 0x1f6   : > { %v680_v62 = vpop.f32.mrf.mxu0 }
 0x1f7   : > { %v681_v63 = vadd.f32 %v1060_v61, %v680_v62 }
 0x1f8   : > { %v1180_v4 = vpop.f32.mrf.mxu0 }
 0x1f9   : > { %1264 = vtanh.f32 %v681_v63 }
 0x1fa   : > { %v683_v5 = vpop.f32.mrf.mxu0 }
 0x1fb   : > { %v684_v6 = vadd.f32 %v1060_v61, %v683_v5 }
 0x1fc   : > { %v1181_v2 = vpop.f32.mrf.mxu0 }
 0x1fd   : > { %1266 = vtanh.f32 %v684_v6 }
 0x206   : > { %v1265_v7 = vpop.eup %1264 }
 0x207   : > { %v701_v1 = vmul.f32 %v1265_v7, %v694_v3 }
 0x20a   : > { %v1267_v8 = vpop.eup %1266 }
 0x20b   : > { %v702_v9 = vmul.f32 %v1267_v8, %v699_v0 }
 0x20d   : > { %v703_v10 = vpack.c.bf16 %v702_v9, %v701_v1 }
 0x20f   : > { %1104 = vst [vmem:[#allocation2] sm:$0xff] %v703_v10   ;;  %1109 = vst [vmem:[%s1468_s13] sm:$0xff] %v703_v10   ;;  %1199 = vmatmul.mubr.bf16.vlgmr.msra.gmra.mxu1 %v703_v10 }
 0x210   : > { %1307 = shalt.err (!%p1304_p10)
}
 0x211   : > { %s1359_s13 = smov 64   ;;  %s1360_s30 = smov 4   ;;  %v716_v11 = vlaneseq }
 0x212   : > { %1207 = dma.vmem_to_hbm [thread:$0]  (%p1570_p3), %s852_s14, 128, %s1603_s7, [#allocation5], %s1359_s13, %s1359_s13, %s1360_s30  }
 0x213   : > { %v717_v12 = vshrl.u32 %v716_v11, 7 }
 0x215   : > { %v718_v13 = vsub.s32 0, %v717_v12 }
 0x217   : > { %v719_v15 = vrot.slane %v1508_v16, %v718_v13 }
 0x2cf   : > { %v803_v14 = vpop.f32.mrf.mxu1 }
 0x2d0   : > { %v804_v19 = vadd.f32 %v803_v14, %v719_v15 }
 0x2d1   : > { %v1200_v17 = vpop.f32.mrf.mxu1 }
 0x2d3   : > { %v806_v18 = vpop.f32.mrf.mxu1 }
 0x2d4   : > { %v807_v20 = vadd.f32 %v806_v18, %v719_v15 }
 0x2d5   : > { %v1201_v21 = vpop.f32.mrf.mxu1 }
 0x2d6   : > { %v1113_v22 = vpack.c.bf16 %v807_v20, %v804_v19 }
 0x2d8   : > { %1114 = vst [vmem:[%s1473_s16] sm:$0xff] %v1113_v22  }
 0x2d9   : > { %1335 = dma.done.wait (%p1570_p3), [#allocation5], 128  }
 0x2da   : > { %1337 = vsyncadd (%p1570_p3), [#allocation5], 4294967168 }
 0x2db PF: > { %s21_s29 = sadd.s32 1, %s1348_s29   ;;  %s1608_s27 = smov %s1344_s28 }
 0x2dc   : > { %p18_p11 = scmp.ge.s32.totalorder %s21_s29, 4   ;;  %s1609_s28 = smov %s1611_s9 }
 0x2de   :  { %20 = sbr.rel (!%p18_p11) target bundleno = 3 (0x3), region = 114 }
 0x2e3   :  { %895 = vsyncpa [#allocation4], 1 }
 0x2e4   :  { %897 = vsyncpa [#allocation4 + $0x1], 1 }
 0x2e5   :  { %898 = vsyncpa [#allocation5], 1 }
 0x2e6   :  { %900 = vsyncpa [#allocation5 + $0x1], 1 }

</bundles_post_ra>
